<compile_context>
chip_gen: v5e
topology: v5e:2x2
jax: 0.10.0
libtpu: 0.0.40
codegen_flags: <defaults>
</compile_context>

<pallas_src>
import functools

import jax
import jax.numpy as jnp
from jax.experimental import pallas as pl
from jax.experimental.pallas import tpu as pltpu


def _round_up(n, m):
    return ((n + m - 1) // m) * m


# ----------------------------------------------------------------------------
# Kernels
# ----------------------------------------------------------------------------
def _mlp1_kernel(x_ref, w1_ref, b1_ref, w2_ref, b2_ref, o_ref, acc_ref):
    """grid = (batch tiles, H tiles). H is the reduction axis of fc2."""
    h_idx = pl.program_id(1)

    @pl.when(h_idx == 0)
    def _init():
        acc_ref[...] = jnp.zeros_like(acc_ref)

    # fc1 slab: [tb, IN_p] @ [IN_p, th]  (f32 accumulation on the MXU)
    h = jnp.dot(x_ref[...], w1_ref[...], preferred_element_type=jnp.float32)
    h = jnp.maximum(h + b1_ref[...], 0.0)                     # bias + ReLU

    # fc2 partial: [tb, th] @ [th, O_p] accumulated in f32 VMEM scratch.
    acc_ref[...] += jnp.dot(h.astype(w2_ref.dtype), w2_ref[...],
                            preferred_element_type=jnp.float32)

    @pl.when(h_idx == pl.num_programs(1) - 1)
    def _finalize():
        o_ref[...] = (acc_ref[...] + b2_ref[...]).astype(o_ref.dtype)


def _mlp1_dropout_kernel(x_ref, mask_ref, w1_ref, b1_ref, w2_ref, b2_ref,
                         o_ref, acc_ref):
    """Training-mode variant: mask already holds 0 or 1/(1-p) (inverted dropout)."""
    h_idx = pl.program_id(1)

    @pl.when(h_idx == 0)
    def _init():
        acc_ref[...] = jnp.zeros_like(acc_ref)

    h = jnp.dot(x_ref[...], w1_ref[...], preferred_element_type=jnp.float32)
    h = jnp.maximum(h + b1_ref[...], 0.0)
    h = h * mask_ref[...]                  # single VPU multiply between the dots

    acc_ref[...] += jnp.dot(h.astype(w2_ref.dtype), w2_ref[...],
                            preferred_element_type=jnp.float32)

    @pl.when(h_idx == pl.num_programs(1) - 1)
    def _finalize():
        o_ref[...] = (acc_ref[...] + b2_ref[...]).astype(o_ref.dtype)


# ----------------------------------------------------------------------------
# Parameter preparation (do ONCE, outside the per-step path)
# ----------------------------------------------------------------------------
def prepare_mlp1_params(w1, b1, w2, b2, *, compute_dtype=jnp.bfloat16):
    """Pad feature dims to multiples of 128 and cast weights to the MXU compute
    dtype.  Biases stay f32 end-to-end (tiny; avoids needless precision loss).

    w1: [in, H], b1: [H], w2: [H, O], b2: [O]  (weights stored pre-transposed).
    """
    IN, H = w1.shape
    O = w2.shape[1]
    IN_p, H_p, O_p = _round_up(IN, 128), _round_up(H, 128), _round_up(O, 128)

    w1_p = jnp.pad(w1.astype(compute_dtype), ((0, IN_p - IN), (0, H_p - H)))
    w2_p = jnp.pad(w2.astype(compute_dtype), ((0, H_p - H), (0, O_p - O)))
    b1_p = jnp.pad(b1.astype(jnp.float32), (0, H_p - H)).reshape(1, H_p)
    b2_p = jnp.pad(b2.astype(jnp.float32), (0, O_p - O)).reshape(1, O_p)

    return dict(w1=w1_p, b1=b1_p, w2=w2_p, b2=b2_p,
                dims=(IN, H, O), padded=(IN_p, H_p, O_p),
                compute_dtype=jnp.dtype(compute_dtype))


# ----------------------------------------------------------------------------
# Forward wrapper
# ----------------------------------------------------------------------------
def mlp1layer_forward(x, params, *, dropout_rate=0.0, training=False,
                      rng_key=None, block_b=512):
    """x: [B, in] -> [B, out].  `params` from prepare_mlp1_params."""
    B, IN = x.shape
    IN0, H0, O0 = params["dims"]
    assert IN == IN0, (IN, IN0)
    IN_p, H_p, O_p = params["padded"]
    cdt = params["compute_dtype"]
    out_dtype = x.dtype
    use_dropout = bool(training) and float(dropout_rate) > 0.0

    # ---- physical VMEM capacity (v7x: 64 MiB/TC; v5e/v6e: 128 MiB) ----------
    try:
        phys_vmem = int(pltpu.get_tpu_info().vmem_capacity_bytes)
        if phys_vmem <= 0:
            raise ValueError
    except Exception:
        phys_vmem = 64 << 20          # conservative fallback (v7x)
    budget = int(phys_vmem * 0.8)

    # ---- batch tile ----------------------------------------------------------
    block_b = max(16, _round_up(min(int(block_b), max(B, 1)), 16))
    if B > 16:
        # >= 2 batch tiles so the "parallel" axis can shard across 2 TCs (v7x).
        block_b = min(block_b, _round_up(-(-B // 2), 16))

    bpe_w = jnp.dtype(cdt).itemsize
    bpe_x = jnp.dtype(cdt).itemsize
    bpe_o = jnp.dtype(out_dtype).itemsize

    def footprint(bb, bh):
        n_h = H_p // bh
        w_buf = 1 if n_h == 1 else 2                 # single-buffer resident W
        wt = w_buf * (IN_p * bh + bh * O_p) * bpe_w + 2 * (bh + O_p) * 4
        stream = 2 * bb * IN_p * bpe_x + 2 * bb * O_p * bpe_o
        if use_dropout:
            stream += 2 * bb * bh * 4
        return wt + stream + bb * O_p * 4 + bb * bh * 4   # + acc + f32 h tile

    # ---- H (reduction) tile: largest divisor-of-H_p multiple of 128 that fits
    block_h = H_p
    while footprint(block_b, block_h) > budget and block_h > 128:
        cand = max(128, ((block_h // 2) // 128) * 128)
        while H_p % cand != 0:
            cand -= 128
        if cand == block_h:
            break
        block_h = cand
    # Shrink the batch tile before anything that touches the MXU N dimension.
    while footprint(block_b, block_h) > budget and block_b > 128:
        block_b = max(128, _round_up(block_b // 2, 16))

    B_p = _round_up(B, block_b)
    n_b, n_h = B_p // block_b, H_p // block_h
    grid = (n_b, n_h)

    # ---- operands ------------------------------------------------------------
    x_p = jnp.pad(x.astype(cdt), ((0, B_p - B), (0, IN_p - IN)))  # fused cast+pad

    inputs = [x_p]
    if use_dropout:
        if rng_key is None:
            rng_key = jax.random.PRNGKey(0)
        keep = jax.random.bernoulli(rng_key, 1.0 - float(dropout_rate), (B, H0))
        mask = keep.astype(jnp.float32) * jnp.float32(1.0 / (1.0 - dropout_rate))
        mask_p = jnp.pad(mask, ((0, B_p - B), (0, H_p - H0)))
        inputs.append(mask_p)
    inputs += [params["w1"], params["b1"], params["w2"], params["b2"]]

    # ---- specs ---------------------------------------------------------------
    def _wspec(shape, imap, resident):
        if n_h == 1 or resident:
            return pl.BlockSpec(shape, imap, pipeline_mode=pl.Buffered(1))
        return pl.BlockSpec(shape, imap)      # streamed slabs: double-buffered

    in_specs = [pl.BlockSpec((block_b, IN_p), lambda i, h: (i, 0))]
    if use_dropout:
        in_specs.append(pl.BlockSpec((block_b, block_h), lambda i, h: (i, h)))
    in_specs += [
        _wspec((IN_p, block_h), lambda i, h: (0, h), resident=False),   # W1
        _wspec((1, block_h), lambda i, h: (0, h), resident=False),      # b1
        _wspec((block_h, O_p), lambda i, h: (h, 0), resident=False),    # W2
        _wspec((1, O_p), lambda i, h: (0, 0), resident=True),           # b2
    ]

    need = footprint(block_b, block_h)
    vmem_limit = int(min(phys_vmem, max(int(need * 1.25), 16 << 20)))

    flops = 2 * B_p * (IN_p * H_p + H_p * O_p)
    bytes_accessed = int(x_p.size * bpe_x
                         + params["w1"].size * bpe_w + params["w2"].size * bpe_w
                         + (params["b1"].size + params["b2"].size) * 4
                         + B_p * O_p * bpe_o
                         + (B_p * H_p * 4 if use_dropout else 0))

    kernel = _mlp1_dropout_kernel if use_dropout else _mlp1_kernel

    out_p = pl.pallas_call(
        kernel,
        out_shape=jax.ShapeDtypeStruct((B_p, O_p), out_dtype),
        grid_spec=pltpu.PrefetchScalarGridSpec(
            num_scalar_prefetch=0,
            grid=grid,
            in_specs=in_specs,
            out_specs=pl.BlockSpec((block_b, O_p), lambda i, h: (i, 0)),
            scratch_shapes=[pltpu.VMEM((block_b, O_p), jnp.float32)],
        ),
        compiler_params=pltpu.CompilerParams(
            dimension_semantics=("parallel", "arbitrary"),
            vmem_limit_bytes=vmem_limit,
        ),
        cost_estimate=pl.CostEstimate(flops=flops, transcendentals=0,
                                      bytes_accessed=bytes_accessed),
    )(*inputs)

    return out_p[:B, :O0]


# ----------------------------------------------------------------------------
# Deterministic init mirroring the module (kaiming_normal_ weights)
# ----------------------------------------------------------------------------
def init_params(key, input_size, hidden_size, output_size, dtype=jnp.float32):
    k1, k2, k3, k4 = jax.random.split(key, 4)
    w1 = jax.random.normal(k1, (input_size, hidden_size), dtype) * jnp.sqrt(
        2.0 / input_size)
    w2 = jax.random.normal(k2, (hidden_size, output_size), dtype) * jnp.sqrt(
        2.0 / hidden_size)
    b1 = jax.random.uniform(k3, (hidden_size,), dtype,
                            -1.0 / jnp.sqrt(input_size),
                            1.0 / jnp.sqrt(input_size))
    b2 = jax.random.uniform(k4, (output_size,), dtype,
                            -1.0 / jnp.sqrt(hidden_size),
                            1.0 / jnp.sqrt(hidden_size))
    return w1, b1, w2, b2


if __name__ == "__main__":
    # Small shapes consistent with the MLP forward. B=50 is deliberately ragged
    # and block_b=16 gives several batch tiles, so padding + pipelining paths
    # are exercised.
    B, IN, H, OUT = 50, 16, 32, 8
    DROPOUT = 0.25

    key = jax.random.PRNGKey(0)
    kx, kp, kd = jax.random.split(key, 3)
    x = jax.random.normal(kx, (B, IN), jnp.float32)
    w1, b1, w2, b2 = init_params(kp, IN, H, OUT)

    ref = jnp.maximum(x @ w1 + b1, 0.0) @ w2 + b2

    # 1) Eval mode, f32 compute: exact (tight tolerance).
    params_f32 = prepare_mlp1_params(w1, b1, w2, b2, compute_dtype=jnp.float32)
    out = mlp1layer_forward(x, params_f32, dropout_rate=DROPOUT,
                            training=False, block_b=16)
    out = jax.block_until_ready(out)
    assert out.shape == (B, OUT)
    assert out.dtype == x.dtype
    assert jnp.allclose(out, ref, atol=1e-4, rtol=1e-4), float(
        jnp.max(jnp.abs(out - ref)))

    # 2) Eval mode, default bf16 compute (MXU-native), f32 accumulation and
    #    f32 output written directly from the kernel.
    params_bf16 = prepare_mlp1_params(w1, b1, w2, b2)  # bf16 default
    out_bf16 = jax.block_until_ready(
        mlp1layer_forward(x, params_bf16, training=False))
    assert out_bf16.dtype == x.dtype
    rel = jnp.linalg.norm(out_bf16 - ref) / jnp.linalg.norm(ref)
    assert float(rel) < 2e-2, float(rel)

    # 3) Training-mode dropout (host-generated inverted-dropout mask), f32:
    #    exactly reproducible against a pure-JAX reference with the same key.
    keep = jax.random.bernoulli(kd, 1.0 - DROPOUT, (B, H))
    mask = keep.astype(jnp.float32) * jnp.float32(1.0 / (1.0 - DROPOUT))
    ref_tr = (jnp.maximum(x @ w1 + b1, 0.0) * mask) @ w2 + b2
    out_tr = mlp1layer_forward(x, params_f32, dropout_rate=DROPOUT,
                               training=True, rng_key=kd, block_b=16)
    out_tr = jax.block_until_ready(out_tr)
    assert out_tr.shape == (B, OUT)
    assert jnp.allclose(out_tr, ref_tr, atol=1e-4, rtol=1e-4), float(
        jnp.max(jnp.abs(out_tr - ref_tr)))

    print("KERNEL_OK")
</pallas_src>

<mosaic_0001>
module attributes {stable_mosaic.version = 11 : i64} {
  func.func @_mlp1_kernel(%arg0: i32, %arg1: i32, %arg2: memref<16x128xf32, #tpu.memory_space<vmem>>, %arg3: memref<128x128xf32, #tpu.memory_space<vmem>>, %arg4: memref<1x128xf32, #tpu.memory_space<vmem>>, %arg5: memref<128x128xf32, #tpu.memory_space<vmem>>, %arg6: memref<1x128xf32, #tpu.memory_space<vmem>>, %arg7: memref<16x128xf32, #tpu.memory_space<vmem>>, %arg8: memref<16x128xf32, #tpu.memory_space<vmem>>) attributes {dimension_semantics = [#tpu.dimension_semantics<parallel>, #tpu.dimension_semantics<arbitrary>], iteration_bounds = array<i64: 4, 1>, scalar_prefetch = 0 : i64, scratch_operands = 1 : i64, tpu.core_type = #tpu.core_type<tc>, window_params = [{transform_indices = @transform_0, window_bounds = array<i64: 16, 128>}, {pipeline_mode = #tpu.pipeline_mode<synchronous>, transform_indices = @transform_1, window_bounds = array<i64: 128, 128>}, {pipeline_mode = #tpu.pipeline_mode<synchronous>, transform_indices = @transform_2, window_bounds = array<i64: 1, 128>}, {pipeline_mode = #tpu.pipeline_mode<synchronous>, transform_indices = @transform_3, window_bounds = array<i64: 128, 128>}, {pipeline_mode = #tpu.pipeline_mode<synchronous>, transform_indices = @transform_4, window_bounds = array<i64: 1, 128>}, {transform_indices = @transform_5, window_bounds = array<i64: 16, 128>}]} {
    %c0_i32 = arith.constant 0 : i32
    %0 = arith.cmpi eq, %arg1, %c0_i32 : i32
    %1 = arith.extui %0 : i1 to i32
    %c0_i32_0 = arith.constant 0 : i32
    %2 = arith.cmpi ne, %1, %c0_i32_0 : i32
    scf.if %2 {
      %cst_16 = arith.constant 0.000000e+00 : f32
      %19 = vector.broadcast %cst_16 : f32 to vector<16x128xf32>
      %c0_17 = arith.constant 0 : index
      %c0_18 = arith.constant 0 : index
      %20 = vector.load %arg8[%c0_17, %c0_18] : memref<16x128xf32, #tpu.memory_space<vmem>>, vector<16x128xf32>
      tpu.vector_store %arg8[%c0_17, %c0_18], %19 {strides = array<i32>} : memref<16x128xf32, #tpu.memory_space<vmem>>, vector<16x128xf32>,
    } else {
    }
    %c0 = arith.constant 0 : index
    %c0_1 = arith.constant 0 : index
    %3 = vector.load %arg2[%c0, %c0_1] : memref<16x128xf32, #tpu.memory_space<vmem>>, vector<16x128xf32>
    %c0_2 = arith.constant 0 : index
    %c0_3 = arith.constant 0 : index
    %4 = vector.load %arg3[%c0_2, %c0_3] : memref<128x128xf32, #tpu.memory_space<vmem>>, vector<128x128xf32>
    %cst = arith.constant dense<0.000000e+00> : vector<16x128xf32>
    %5 = tpu.matmul %3, %4, %cst {dimension_numbers = #tpu.dot_dimension_numbers<[1], [0], [0], [1], [0, 0, 1, 1], [], []>} : vector<16x128xf32>, vector<128x128xf32>, vector<16x128xf32> -> vector<16x128xf32>
    %c0_4 = arith.constant 0 : index
    %c0_5 = arith.constant 0 : index
    %6 = vector.load %arg4[%c0_4, %c0_5] : memref<1x128xf32, #tpu.memory_space<vmem>>, vector<1x128xf32>
    %7 = vector.broadcast %6 : vector<1x128xf32> to vector<16x128xf32>
    %8 = arith.addf %5, %7 : vector<16x128xf32>
    %cst_6 = arith.constant 0.000000e+00 : f32
    %9 = vector.broadcast %cst_6 : f32 to vector<16x128xf32>
    %10 = arith.maximumf %8, %9 : vector<16x128xf32>
    %c0_7 = arith.constant 0 : index
    %c0_8 = arith.constant 0 : index
    %11 = vector.load %arg8[%c0_7, %c0_8] : memref<16x128xf32, #tpu.memory_space<vmem>>, vector<16x128xf32>
    %c0_9 = arith.constant 0 : index
    %c0_10 = arith.constant 0 : index
    %12 = vector.load %arg5[%c0_9, %c0_10] : memref<128x128xf32, #tpu.memory_space<vmem>>, vector<128x128xf32>
    %cst_11 = arith.constant dense<0.000000e+00> : vector<16x128xf32>
    %13 = tpu.matmul %10, %12, %cst_11 {dimension_numbers = #tpu.dot_dimension_numbers<[1], [0], [0], [1], [0, 0, 1, 1], [], []>} : vector<16x128xf32>, vector<128x128xf32>, vector<16x128xf32> -> vector<16x128xf32>
    %14 = arith.addf %11, %13 : vector<16x128xf32>
    %c0_12 = arith.constant 0 : index
    %c0_13 = arith.constant 0 : index
    %15 = vector.load %arg8[%c0_12, %c0_13] : memref<16x128xf32, #tpu.memory_space<vmem>>, vector<16x128xf32>
    tpu.vector_store %arg8[%c0_12, %c0_13], %14 {strides = array<i32>} : memref<16x128xf32, #tpu.memory_space<vmem>>, vector<16x128xf32>,
    %c0_i32_14 = arith.constant 0 : i32
    %16 = arith.cmpi eq, %arg1, %c0_i32_14 : i32
    %17 = arith.extui %16 : i1 to i32
    %c0_i32_15 = arith.constant 0 : i32
    %18 = arith.cmpi ne, %17, %c0_i32_15 : i32
    scf.if %18 {
      %c0_16 = arith.constant 0 : index
      %c0_17 = arith.constant 0 : index
      %19 = vector.load %arg8[%c0_16, %c0_17] : memref<16x128xf32, #tpu.memory_space<vmem>>, vector<16x128xf32>
      %c0_18 = arith.constant 0 : index
      %c0_19 = arith.constant 0 : index
      %20 = vector.load %arg6[%c0_18, %c0_19] : memref<1x128xf32, #tpu.memory_space<vmem>>, vector<1x128xf32>
      %21 = vector.broadcast %20 : vector<1x128xf32> to vector<16x128xf32>
      %22 = arith.addf %19, %21 : vector<16x128xf32>
      %c0_20 = arith.constant 0 : index
      %c0_21 = arith.constant 0 : index
      %23 = vector.load %arg7[%c0_20, %c0_21] : memref<16x128xf32, #tpu.memory_space<vmem>>, vector<16x128xf32>
      tpu.vector_store %arg7[%c0_20, %c0_21], %22 {strides = array<i32>} : memref<16x128xf32, #tpu.memory_space<vmem>>, vector<16x128xf32>,
    } else {
    }
    return
  }
  func.func @transform_0(%arg0: i32, %arg1: i32) -> (i32, i32) {
    %c0_i32 = arith.constant 0 : i32
    %c0_i32_0 = arith.constant 0 : i32
    return %arg0, %c0_i32 : i32, i32
  }
  func.func @transform_1(%arg0: i32, %arg1: i32) -> (i32, i32) {
    %c0_i32 = arith.constant 0 : i32
    %c0_i32_0 = arith.constant 0 : i32
    return %c0_i32, %arg1 : i32, i32
  }
  func.func @transform_2(%arg0: i32, %arg1: i32) -> (i32, i32) {
    %c0_i32 = arith.constant 0 : i32
    %c0_i32_0 = arith.constant 0 : i32
    return %c0_i32, %arg1 : i32, i32
  }
  func.func @transform_3(%arg0: i32, %arg1: i32) -> (i32, i32) {
    %c0_i32 = arith.constant 0 : i32
    %c0_i32_0 = arith.constant 0 : i32
    return %arg1, %c0_i32 : i32, i32
  }
  func.func @transform_4(%arg0: i32, %arg1: i32) -> (i32, i32) {
    %c0_i32 = arith.constant 0 : i32
    %c0_i32_0 = arith.constant 0 : i32
    %c0_i32_1 = arith.constant 0 : i32
    return %c0_i32, %c0_i32_0 : i32, i32
  }
  func.func @transform_5(%arg0: i32, %arg1: i32) -> (i32, i32) {
    %c0_i32 = arith.constant 0 : i32
    %c0_i32_0 = arith.constant 0 : i32
    return %arg0, %c0_i32 : i32, i32
  }
}

</mosaic_0001>

<bundles_post_ra>
// kernel: tpu_custom_call.1
= control target key start
LH: loop header
LB: loop body
LE: loop exit
PB: predicated region body
PF: predicated region fallthrough
CT: control target
= control target key end

     0   :  { %s1089_s0 = inlined_call_operand.hbm [shape: f32[64,128], index: 0, kind: input, shape index: {}]   ;;  %s1090_s1 = inlined_call_operand.hbm [shape: f32[128,128], index: 1, kind: input, shape index: {}]   ;;  %s1091_s2 = inlined_call_operand.vmem [shape: f32[1,128], index: 2, kind: input, shape index: {}]   ;;  %s1092_s3 = inlined_call_operand.hbm [shape: f32[128,128], index: 3, kind: input, shape index: {}]   ;;  %s1093_s4 = inlined_call_operand.vmem [shape: f32[1,128], index: 4, kind: input, shape index: {}]   ;;  %s1094_s5 = inlined_call_operand.hbm [shape: f32[64,128], index: 5, kind: output, shape index: {}]  }
   0x1   :  { %1097 = sst [smem:[#allocation13_spill]] %s1090_s1 }
   0x2   :  { %1098 = sst [smem:[#allocation14_spill]] %s1092_s3 }
   0x3   :  { %10 = vsyncpa [#allocation4], 0 }
   0x4   :  { %12 = vsyncpa [#allocation4 + $0x1], 0 }
   0x5   :  { %13 = vsyncpa [#allocation7], 0 }
   0x6   :  { %14 = vsyncpa [#allocation5], 0 }
   0x7   :  { %16 = vsyncpa [#allocation5 + $0x1], 0  ;;  %s922_s18 = smov 0   ;;  %s924_s19 = smov 0  }
   0x8   :  { %s926_s20 = smov 0   ;;  %s928_s21 = smov 0  }
   0x9   :  { %s930_s22 = smov 0   ;;  %s932_s23 = smov 0  }
   0xa LB: > { %s565_s24 = sadd.s32 4294967295, %s884_s23   ;;  %s566_s25 = sadd.s32 4294967294, %s884_s23   ;;  %s884_s23 = sphi %s932_s23, %s22_s23   ;;  %s880_s22 = sphi %s930_s22, %s1112_s22   ;;  %s876_s21 = sphi %s928_s21, %s1111_s21   ;;  %s872_s20 = sphi %s926_s20, %s1110_s20   ;;  %s868_s19 = sphi %s924_s19, %s1109_s19   ;;  %s864_s18 = sphi %s922_s18, %s1108_s18  }
   0xb   : > { %p54_p0 = scmp.ne.s32.totalorder %s868_s19, %s864_s18  ;;  %p958_p1 = scmp.eq.s32.totalorder %s565_s24, 0 }
   0xc   : > { %p183_p2 = scmp.eq.s32.totalorder %s566_s25, 3  ;;  %p567_p4 = scmp.ge.s32.totalorder %s884_s23, 1 }
   0xd   : > { %p964_p3 = por %p958_p1, %p54_p0  ;;  %p190_p6 = scmp.lt.s32.totalorder %s884_s23, 5 }
   0xe   : > { %p969_p5 = por %p183_p2, %p54_p0  ;;  %s1102_s1 = sld [smem:[#allocation13_spill]] }
   0xf   : > { %p977_p7 = pnand %p567_p4, %p190_p6  ;;  %s886_s8 = smov [#allocation6]  }
  0x10   : > { %s205_s9 = sshll.u32 %s886_s8, 4  ;;  %s1104_s3 = sld [smem:[#allocation14_spill]]  ;;  %s206_s9 = int_to_ptr.vmem [resolvable:$true] %s205_s9 }
  0x11   : > { %p631_p8 = pneg %p977_p7  ;;  %s1095_s13 = smov 128  }
  0x12   : > { %s1096_s14 = smov 8   ;;  %s889_s15 = smov [#allocation8]  }
  0x13   : > { %p632_p9 = pnand %p631_p8, %p958_p1  ;;  %s228_s16 = sshll.u32 %s889_s15, 4  ;;  %s229_s16 = int_to_ptr.vmem [resolvable:$true] %s228_s16 }
  0x14   : > { %s203_s6 = sshll.u32 %s1102_s1, 4  ;;  %p177_p10 = scmp.eq.s32.totalorder %s565_s24, 3  ;;  %s204_s6 = int_to_ptr.hbm [resolvable:$true] %s203_s6 }
  0x15   : > { %634 = dma.hbm_to_vmem [thread:$0]  (!%p632_p9), %s204_s6, 2048, %s206_s9, [#allocation7], %s1095_s13, %s1095_s13, %s1096_s14  }
  0x16   : > { %s226_s12 = sshll.u32 %s1104_s3, 4  ;;  %s34_s17 = sadd.s32 1, %s880_s22  ;;  %s227_s12 = int_to_ptr.hbm [resolvable:$true] %s226_s12 }
  0x17   : > { %637 = dma.hbm_to_vmem [thread:$0]  (!%p632_p9), %s227_s12, 2048, %s229_s16, [#allocation7], %s1095_s13, %s1095_s13, %s1096_s14  }
  0x18   : > { %p36_p11 = scmp.ge.s32.totalorder %s34_s17, 4  ;;  %s41_s25 = sadd.s32 1, %s872_s20 }
  0x19   : > { %p48_p12 = scmp.ne.s32.totalorder %s872_s20, %s868_s19  ;;  %p49_p13 = scmp.eq.s32.totalorder %s884_s23, 0 }
  0x1a   : > { %s1114_s17 = smov (%p36_p11, %s34_s17), 0  ;;  %p648_p2 = scmp.lt.s32.totalorder %s884_s23, 4 }
  0x1b   : > { %p1003_p0 = por %p177_p10, %p48_p12  ;;  %s38_s30 = ssub.s32 %s880_s22, %s1114_s17 }
  0x1c   : > { %s245_s6 = sand.u32 1, %s872_s20   ;;  %p39_p4 = scmp.eq.s32.totalorder %s38_s30, 0 }
  0x1d   : > { %p50_p6 = por %p49_p13, %p48_p12  ;;  %s572_s8 = sshll.u32 %s245_s6, 4 }
  0x1e   : > { %s585_s24 = sshll.u32 %s880_s22, 4  ;;  %s249_s16 = scalar_lea.vmem [#allocation3], %s572_s8 }
  0x1f   : > { %s1013_s9 = scalar_select %p39_p4, %s872_s20, %s41_s25  }
  0x20   : > { %s254_s12 = scalar_lea.hbm %s1089_s0, %s585_s24  ;;  %s257_s13 = sshll.u32 %s249_s16, 4  ;;  %s258_s13 = int_to_ptr.vmem [resolvable:$true] %s257_s13 }
  0x21   : > { %s255_s15 = sshll.u32 %s254_s12, 4  ;;  %p639_p8 = pnand %p648_p2, %p50_p6  ;;  %s256_s15 = int_to_ptr.hbm [resolvable:$true] %s255_s15 }
  0x22   : > { %s246_s14 = scalar_lea.sflag [#allocation4], %s245_s6  ;;  %s1106_s1 = smov 8  }
  0x23   : > { %s1107_s3 = smov 128   ;;  %269 = sbr.rel (%p977_p7) target bundleno = 349 (0x15d), region = 40 }
  0x24   : > { %641 = dma.hbm_to_vmem [thread:$0]  (!%p639_p8), %s256_s15, 256, %s258_s13, %s246_s14, %s1107_s3, %s1107_s3, %s1106_s1  }
  0x25   : > { %s1026_s25 = sand.u32 (!%p977_p7), 1, %s868_s19  }
  0x26   : > { %s576_s30 = sshll.u32 (!%p977_p7), %s1026_s25, 4  ;;  %s272_s8 = scalar_lea.sflag (!%p977_p7), [#allocation4], %s1026_s25 }
  0x27   : > { %s1032_s24 = scalar_lea.vmem (!%p977_p7), [#allocation3], %s576_s30 }
  0x28   : > { %851 = dma.done.wait (%p964_p3), %s272_s8, 256  }
  0x29   : > { %853 = vsyncadd (%p964_p3), %s272_s8, 4294967040 }
  0x2a   : > { %855 = dma.done.wait (%p958_p1), [#allocation7], 4096  }
  0x2b   : > { %857 = vsyncadd (%p958_p1), [#allocation7], 4294963200  ;;  %v345_v0 = vld [vmem:[#allocation6 + $0x78] sm:$0xff]  ;;  %v344_v1 = vld [vmem:[#allocation6 + $0x70] sm:$0xff]  ;;  %s315_s7 = scalar_lea.vmem [#allocation9], %s576_s30  ;;  %s586_s13 = sshll.u32 %s876_s21, 4 }
  0x2c   : > { %587 = vmatpush.msra.mxu2 %v345_v0  ;;  %350 = vmatpush.msra.mxu0 %v345_v0  ;;  %v343_v2 = vld [vmem:[#allocation6 + $0x68] sm:$0xff]  ;;  %v342_v3 = vld [vmem:[#allocation6 + $0x60] sm:$0xff]  ;;  %v341_v4 = vld [vmem:[#allocation6 + $0x58] sm:$0xff]  ;;  %s445_s10 = scalar_lea.hbm %s1094_s5, %s586_s13  ;;  %s446_s11 = sshll.u32 %s315_s7, 4  ;;  %s447_s11 = int_to_ptr.vmem [resolvable:$true] %s446_s11 }
  0x2d   : > { %v392_v5 = vld [vmem:[#allocation8 + $0x78] sm:$0xff]  ;;  %v391_v6 = vld [vmem:[#allocation8 + $0x70] sm:$0xff]  ;;  %v390_v8 = vld [vmem:[#allocation8 + $0x68] sm:$0xff]  ;;  %s448_s12 = sshll.u32 %s445_s10, 4  ;;  %s434_s15 = scalar_lea.sflag [#allocation5], %s1026_s25  ;;  %s449_s12 = int_to_ptr.hbm [resolvable:$true] %s448_s12 }
  0x2e   : > { %588 = vmatpush.msra.mxu2 %v344_v1  ;;  %351 = vmatpush.msra.mxu0 %v344_v1  ;;  %v340_v7 = vld [vmem:[#allocation6 + $0x50] sm:$0xff]  ;;  %v339_v9 = vld [vmem:[#allocation6 + $0x48] sm:$0xff]  ;;  %v389_v10 = vld [vmem:[#allocation8 + $0x60] sm:$0xff]  ;;  %s812_s16 = sshra.s32 %s449_s12, 4  ;;  %s813_s16 = int_to_ptr.hbm [resolvable:$true] %s812_s16 }
  0x2f   : > { %603 = vmatpush.msra.mxu3 %v392_v5  ;;  %393 = vmatpush.msra.mxu1 %v392_v5  ;;  %v338_v11 = vld [vmem:[#allocation6 + $0x40] sm:$0xff]  ;;  %v388_v12 = vld [vmem:[#allocation8 + $0x58] sm:$0xff]  ;;  %v387_v14 = vld [vmem:[#allocation8 + $0x50] sm:$0xff]  ;;  %s814_s8 = scalar_lea.hbm %s813_s16, 16  ;;  %p819_p9 = scmp.lt.s32.totalorder %s813_s16, %s1094_s5 }
  0x30   : > { %589 = vmatpush.msra.mxu2 %v343_v2  ;;  %352 = vmatpush.msra.mxu0 %v343_v2  ;;  %v337_v13 = vld [vmem:[#allocation6 + $0x38] sm:$0xff]  ;;  %v336_v15 = vld [vmem:[#allocation6 + $0x30] sm:$0xff]  ;;  %v386_v16 = vld [vmem:[#allocation8 + $0x48] sm:$0xff]  ;;  %p815_p1 = scmp.ne.s32.totalorder %s813_s16, %s814_s8 }
  0x31   : > { %604 = vmatpush.msra.mxu3 %v391_v6  ;;  %394 = vmatpush.msra.mxu1 %v391_v6  ;;  %v335_v17 = vld [vmem:[#allocation6 + $0x28] sm:$0xff]  ;;  %v385_v18 = vld [vmem:[#allocation8 + $0x40] sm:$0xff]  ;;  %v384_v20 = vld [vmem:[#allocation8 + $0x38] sm:$0xff] }
  0x32   : > { %590 = vmatpush.msra.mxu2 %v342_v3  ;;  %353 = vmatpush.msra.mxu0 %v342_v3  ;;  %v334_v19 = vld [vmem:[#allocation6 + $0x20] sm:$0xff]  ;;  %v333_v21 = vld [vmem:[#allocation6 + $0x18] sm:$0xff]  ;;  %v383_v22 = vld [vmem:[#allocation8 + $0x30] sm:$0xff]  ;;  %p816_p3 = pnand %p815_p1, %p1003_p0 }
  0x33   : > { %605 = vmatpush.msra.mxu3 %v390_v8  ;;  %395 = vmatpush.msra.mxu1 %v390_v8  ;;  %v332_v23 = vld [vmem:[#allocation6 + $0x10] sm:$0xff]  ;;  %v382_v24 = vld [vmem:[#allocation8 + $0x28] sm:$0xff]  ;;  %v381_v26 = vld [vmem:[#allocation8 + $0x20] sm:$0xff] }
  0x34   : > { %591 = vmatpush.msra.mxu2 %v341_v4  ;;  %354 = vmatpush.msra.mxu0 %v341_v4  ;;  %v331_v25 = vld [vmem:[#allocation6 + $0x8] sm:$0xff]  ;;  %v330_v27 = vld [vmem:[#allocation6] sm:$0xff]  ;;  %v380_v30 = vld [vmem:[#allocation8 + $0x18] sm:$0xff]  ;;  %p817_p7 = pneg %p816_p3 }
  0x35   : > { %606 = vmatpush.msra.mxu3 %v389_v10  ;;  %396 = vmatpush.msra.mxu1 %v389_v10  ;;  %v329_v28 = vld [vmem:[%s1032_s24 + $0x8] sm:$0xff]  ;;  %v328_v29 = vld [vmem:[%s1032_s24] sm:$0xff]  ;;  %s818_s24 = scalar_lea.hbm %s1094_s5, 64 }
  0x36   : > { %592 = vmatpush.msra.mxu2 %v340_v7  ;;  %355 = vmatpush.msra.mxu0 %v340_v7  ;;  %v379_v31 = vld [vmem:[#allocation8 + $0x10] sm:$0xff]  ;;  %v378_v32 = vld [vmem:[#allocation8 + $0x8] sm:$0xff]  ;;  %v377_v33 = vld [vmem:[#allocation8] sm:$0xff]  ;;  %p820_p10 = scmp.lt.s32.totalorder %s818_s24, %s814_s8 }
  0x37   : > { %607 = vmatpush.msra.mxu3 %v388_v12  ;;  %397 = vmatpush.msra.mxu1 %v388_v12  ;;  %v706_v34 = vld [vmem:[%s1091_s2] ss:$0 sm:$0xff] }
  0x38   : > { %593 = vmatpush.msra.mxu2 %v339_v9  ;;  %356 = vmatpush.msra.mxu0 %v339_v9  ;;  %v707_v41 = vld [vmem:[%s1093_s4] ss:$0 sm:$0xff]  ;;  %p821_p11 = por %p820_p10, %p819_p9 }
  0x39   : > { %608 = vmatpush.msra.mxu3 %v387_v14  ;;  %398 = vmatpush.msra.mxu1 %v387_v14 }
  0x3a   : > { %594 = vmatpush.msra.mxu2 %v338_v11  ;;  %357 = vmatpush.msra.mxu0 %v338_v11  ;;  %p822_p12 = pnand %p821_p11, %p817_p7 }
  0x3b   : > { %609 = vmatpush.msra.mxu3 %v386_v16  ;;  %399 = vmatpush.msra.mxu1 %v386_v16 }
  0x3c   : > { %595 = vmatpush.msra.mxu2 %v337_v13  ;;  %358 = vmatpush.msra.mxu0 %v337_v13 }
  0x3d   : > { %610 = vmatpush.msra.mxu3 %v385_v18  ;;  %400 = vmatpush.msra.mxu1 %v385_v18 }
  0x3e   : > { %596 = vmatpush.msra.mxu2 %v336_v15  ;;  %359 = vmatpush.msra.mxu0 %v336_v15 }
  0x3f   : > { %611 = vmatpush.msra.mxu3 %v384_v20  ;;  %401 = vmatpush.msra.mxu1 %v384_v20 }
  0x40   : > { %597 = vmatpush.msra.mxu2 %v335_v17  ;;  %360 = vmatpush.msra.mxu0 %v335_v17 }
  0x41   : > { %612 = vmatpush.msra.mxu3 %v383_v22  ;;  %402 = vmatpush.msra.mxu1 %v383_v22 }
  0x42   : > { %598 = vmatpush.msra.mxu2 %v334_v19  ;;  %361 = vmatpush.msra.mxu0 %v334_v19 }
  0x43   : > { %613 = vmatpush.msra.mxu3 %v382_v24  ;;  %403 = vmatpush.msra.mxu1 %v382_v24 }
  0x44   : > { %599 = vmatpush.msra.mxu2 %v333_v21  ;;  %362 = vmatpush.msra.mxu0 %v333_v21 }
  0x45   : > { %614 = vmatpush.msra.mxu3 %v381_v26  ;;  %404 = vmatpush.msra.mxu1 %v381_v26 }
  0x46   : > { %600 = vmatpush.msra.mxu2 %v332_v23  ;;  %363 = vmatpush.msra.mxu0 %v332_v23 }
  0x47   : > { %615 = vmatpush.msra.mxu3 %v380_v30  ;;  %405 = vmatpush.msra.mxu1 %v380_v30 }
  0x48   : > { %601 = vmatpush.msra.mxu2 %v331_v25  ;;  %364 = vmatpush.msra.mxu0 %v331_v25 }
  0x49   : > { %616 = vmatpush.msra.mxu3 %v379_v31  ;;  %406 = vmatpush.msra.mxu1 %v379_v31 }
  0x4a   : > { %602 = vmatpush.msra.mxu2 %v330_v27  ;;  %365 = vmatpush.msra.mxu0 %v330_v27 }
  0x4b   : > { %369 = vmatmul.f32.vlgmr.msra.gmra.mxu2 %v329_v28  ;;  %366 = vmatmul.f32.vlgmr.msra.gmra.mxu0 %v328_v29 }
  0x4c   : > { %617 = vmatpush.msra.mxu3 %v378_v32  ;;  %407 = vmatpush.msra.mxu1 %v378_v32 }
  0x4e   : > { %618 = vmatpush.msra.mxu3 %v377_v33  ;;  %408 = vmatpush.msra.mxu1 %v377_v33 }
  0xc8   : > { %v367_v35 = vpop.f32.mrf.mxu0 }
  0xc9   : > { %v368_v36 = vadd.f32 %v706_v34, %v367_v35 }
  0xcb   : > { %v373_v37 = vmax.f32 %v368_v36, 0.0 }
  0xcd   : > { %409 = vmatmul.f32.vlgmr.msra.gmra.mxu1 %v373_v37 }
  0xce   : > { %v370_v38 = vpop.f32.mrf.mxu2 }
  0xcf   : > { %v371_v39 = vadd.f32 %v706_v34, %v370_v38 }
  0xd1   : > { %v374_v40 = vmax.f32 %v371_v39, 0.0 }
  0xd3   : > { %412 = vmatmul.f32.vlgmr.msra.gmra.mxu3 %v374_v40 }
 0x14a   : > { %v410_v42 = vpop.f32.mrf.mxu1 }
 0x14b   : > { %v429_v43 = vadd.f32 %v707_v41, %v410_v42 }
 0x14d   : > { %431 = vst [vmem:[%s315_s7] sm:$0xff] %v429_v43 }
 0x156   : > { %v413_v44 = vpop.f32.mrf.mxu3 }
 0x157   : > { %v430_v45 = vadd.f32 %v707_v41, %v413_v44 }
 0x159   : > { %432 = vst [vmem:[%s315_s7 + $0x8] sm:$0xff] %v430_v45 }
 0x15a   : > { %825 = shalt.err (!%p822_p12)
}
 0x15b   : > { %s890_s25 = smov 128   ;;  %s891_s26 = smov 8  }
 0x15c   : > { %629 = dma.vmem_to_hbm [thread:$0]  (%p1003_p0), %s447_s11, 256, %s449_s12, %s434_s15, %s890_s25, %s890_s25, %s891_s26  }
 0x15d PF: > { %p651_p13 = scmp.ge.s32.totalorder %s884_s23, 2  ;;  %s463_s27 = sand.u32 1, %s864_s18  }
 0x15e   : > { %s464_s7 = scalar_lea.sflag [#allocation5], %s463_s27 }
 0x15f   : > { %p643_p2 = pnand %p651_p13, %p969_p5 }
 0x161   : > { %p644_p4 = pneg %p643_p2 }
 0x163   : > { %859 = dma.done.wait (%p644_p4), %s464_s7, 256  }
 0x164   : > { %861 = vsyncadd (%p644_p4), %s464_s7, 4294967040  ;;  %s22_s23 = sadd.s32 1, %s884_s23   ;;  %s1108_s18 = smov %s868_s19 }
 0x165   : > { %p19_p6 = scmp.ge.s32.totalorder %s22_s23, 6   ;;  %s1109_s19 = smov %s872_s20 }
 0x166   : > { %s1110_s20 = smov %s1013_s9  ;;  %s1111_s21 = smov %s880_s22 }
 0x167   : > { %s1112_s22 = smov %s1114_s17  ;;  %21 = sbr.rel (!%p19_p6) target bundleno = 10 (0xa), region = 106 }
 0x16c   :  { %470 = vsyncpa [#allocation4], 1 }
 0x16d   :  { %472 = vsyncpa [#allocation4 + $0x1], 1 }
 0x16e   :  { %473 = vsyncpa [#allocation7], 1 }
 0x16f   :  { %474 = vsyncpa [#allocation5], 1 }
 0x170   :  { %476 = vsyncpa [#allocation5 + $0x1], 1 }

</bundles_post_ra>
